<compile_context>
chip_gen: v5e
topology: v5e:2x2
jax: 0.10.0
libtpu: 0.0.40
codegen_flags: <defaults>
</compile_context>

<pallas_src>
import functools
import math

import jax
import jax.numpy as jnp
from jax.experimental import pallas as pl
from jax.experimental.pallas import tpu as pltpu

_LN_EPS = 1e-5  # PyTorch nn.LayerNorm default


def _layer_norm(x, gamma, beta):
    mu = jnp.mean(x, axis=-1, keepdims=True)
    var = jnp.mean(jnp.square(x - mu), axis=-1, keepdims=True)
    return (x - mu) * jax.lax.rsqrt(var + _LN_EPS) * gamma + beta


def _gelu_tanh(x):
    # TODO(synk): PyTorch F.gelu defaults to the exact erf form; the tanh
    # approximation is used here because tanh has a guaranteed EUP lowering
    # in Mosaic (max abs deviation ~3e-4 from the erf form).
    c = math.sqrt(2.0 / math.pi)
    return 0.5 * x * (1.0 + jnp.tanh(c * (x + 0.044715 * x * x * x)))


def _block_kernel(x_ref,
                  ln1_g_ref, ln1_b_ref, wqkv_ref, wo_ref, bo_ref,
                  ln2_g_ref, ln2_b_ref, w1_ref, b1_ref, w2_ref, b2_ref,
                  o_ref, *, heads, dim_head, scale):
    x = x_ref[0]                                   # (N, D)
    n, d = x.shape
    inner = heads * dim_head

    # ---------- PreNorm + Attention + residual ----------
    xn = _layer_norm(x, ln1_g_ref[...], ln1_b_ref[...])
    # (N, D) @ (D, 3*inner) -> (N, 3*inner); f32 accumulation on the MXU.
    qkv = jnp.dot(xn, wqkv_ref[...], preferred_element_type=jnp.float32)

    attn_out = jnp.zeros((n, d), jnp.float32)
    for h in range(heads):                         # static unroll over heads
        lo = h * dim_head
        hi = (h + 1) * dim_head
        q_h = qkv[:, lo:hi]
        k_h = qkv[:, inner + lo:inner + hi]
        v_h = qkv[:, 2 * inner + lo:2 * inner + hi]
        # q @ k^T without an explicit transpose (contract last dims).
        s = jax.lax.dot_general(
            q_h, k_h, (((1,), (1,)), ((), ())),
            preferred_element_type=jnp.float32) * scale
        s = s - jnp.max(s, axis=-1, keepdims=True)
        p = jnp.exp(s)
        a = p / jnp.sum(p, axis=-1, keepdims=True)
        ctx = jnp.dot(a, v_h, preferred_element_type=jnp.float32)   # (N, dh)
        # Fold the output projection per head: avoids a head concat.
        attn_out = attn_out + jnp.dot(
            ctx, wo_ref[lo:hi, :], preferred_element_type=jnp.float32)
    attn_out = attn_out + bo_ref[...]
    x1 = x + attn_out

    # ---------- PreNorm + FeedForward + residual ----------
    x1n = _layer_norm(x1, ln2_g_ref[...], ln2_b_ref[...])
    h1 = jnp.dot(x1n, w1_ref[...], preferred_element_type=jnp.float32) + b1_ref[...]
    g = _gelu_tanh(h1)
    ffn = jnp.dot(g, w2_ref[...], preferred_element_type=jnp.float32) + b2_ref[...]
    o_ref[0] = (x1 + ffn).astype(o_ref.dtype)


def _transformer_block(x, p, *, heads, dim_head):
    """y = x + Attn(LN(x)); y = y + FFN(LN(y)); one fused pallas_call."""
    B, N, D = x.shape
    inner = heads * dim_head
    mlp = p["w1_t"].shape[1]
    scale = dim_head ** (-0.5)

    kernel = functools.partial(
        _block_kernel, heads=heads, dim_head=dim_head, scale=scale)

    # Advisory cost estimate (helps XLA scheduling around the custom call).
    flops = B * (2 * N * D * 3 * inner            # qkv
                 + heads * 4 * N * N * dim_head    # scores + ctx
                 + 2 * N * inner * D               # out projection
                 + 2 * N * D * mlp + 2 * N * mlp * D)  # MLP
    transcendentals = B * (heads * N * N + N * mlp)
    weight_bytes = sum(int(v.size) * v.dtype.itemsize for v in p.values())
    bytes_accessed = 2 * B * N * D * x.dtype.itemsize + weight_bytes
    cost = pl.CostEstimate(flops=flops, transcendentals=transcendentals,
                           bytes_accessed=bytes_accessed)

    full2d = lambda i: (0, 0)

    return pl.pallas_call(
        kernel,
        out_shape=jax.ShapeDtypeStruct((B, N, D), x.dtype),
        grid_spec=pltpu.PrefetchScalarGridSpec(
            num_scalar_prefetch=0,
            grid=(B,),
            in_specs=[
                pl.BlockSpec((1, N, D), lambda i: (i, 0, 0)),   # x (per batch)
                pl.BlockSpec((1, D), full2d),                   # ln1 gamma
                pl.BlockSpec((1, D), full2d),                   # ln1 beta
                pl.BlockSpec((D, 3 * inner), full2d),           # Wqkv^T
                pl.BlockSpec((inner, D), full2d),               # Wo^T
                pl.BlockSpec((1, D), full2d),                   # bo
                pl.BlockSpec((1, D), full2d),                   # ln2 gamma
                pl.BlockSpec((1, D), full2d),                   # ln2 beta
                pl.BlockSpec((D, mlp), full2d),                 # W1^T
                pl.BlockSpec((1, mlp), full2d),                 # b1
                pl.BlockSpec((mlp, D), full2d),                 # W2^T
                pl.BlockSpec((1, D), full2d),                   # b2
            ],
            out_specs=pl.BlockSpec((1, N, D), lambda i: (i, 0, 0)),
        ),
        compiler_params=pltpu.CompilerParams(
            dimension_semantics=("parallel",)),
        cost_estimate=cost,
    )(x, p["ln1_g"], p["ln1_b"], p["wqkv_t"], p["wo_t"], p["bo"],
      p["ln2_g"], p["ln2_b"], p["w1_t"], p["b1"], p["w2_t"], p["b2"])


class Transformer:
    """JAX/Pallas counterpart of the PyTorch Transformer module."""

    def __init__(self, dim, depth, heads, dim_head, mlp_dim, dropout=0.0,
                 *, key, dtype=jnp.float32):
        # dropout is identity at inference (and 0.0 by default) — omitted.
        self.heads = heads
        self.dim_head = dim_head
        inner = heads * dim_head
        project_out = not (heads == 1 and dim_head == dim)

        def linear_w(k, fan_in, fan_out):
            bound = 1.0 / math.sqrt(fan_in)
            return jax.random.uniform(k, (fan_out, fan_in), dtype, -bound, bound)

        def linear_b(k, fan_in, fan_out):
            bound = 1.0 / math.sqrt(fan_in)
            return jax.random.uniform(k, (1, fan_out), dtype, -bound, bound)

        self.layers = []
        for lk in jax.random.split(key, depth):
            ks = jax.random.split(lk, 6)
            wqkv = linear_w(ks[0], dim, 3 * inner)
            if project_out:
                wo = linear_w(ks[1], inner, dim)
                bo = linear_b(ks[2], inner, dim)
            else:
                wo = jnp.eye(inner, dtype=dtype)
                bo = jnp.zeros((1, dim), dtype)
            w1 = linear_w(ks[3], dim, mlp_dim)
            b1 = linear_b(ks[4], dim, mlp_dim)
            w2 = linear_w(ks[5], mlp_dim, dim)
            b2 = linear_b(jax.random.fold_in(lk, 7), mlp_dim, dim)
            self.layers.append(dict(
                ln1_g=jnp.ones((1, dim), dtype), ln1_b=jnp.zeros((1, dim), dtype),
                wqkv_t=wqkv.T, wo_t=wo.T, bo=bo,
                ln2_g=jnp.ones((1, dim), dtype), ln2_b=jnp.zeros((1, dim), dtype),
                w1_t=w1.T, b1=b1, w2_t=w2.T, b2=b2,
            ))

    def __call__(self, x):
        features = []
        for p in self.layers:
            x = _transformer_block(x, p, heads=self.heads, dim_head=self.dim_head)
            features.append(x)
        return features


# ----------------------------- pure-JAX reference -----------------------------
def _reference(x, layers, heads, dim_head):
    hp = jax.lax.Precision.HIGHEST
    mm = functools.partial(jnp.matmul, precision=hp)
    feats = []
    scale = dim_head ** (-0.5)
    for p in layers:
        B, N, D = x.shape
        xn = _layer_norm(x, p["ln1_g"], p["ln1_b"])
        qkv = mm(xn, p["wqkv_t"])
        q, k, v = jnp.split(qkv, 3, axis=-1)
        sh = lambda t: t.reshape(B, N, heads, dim_head).transpose(0, 2, 1, 3)
        q, k, v = sh(q), sh(k), sh(v)
        dots = jnp.einsum("bhnd,bhmd->bhnm", q, k, precision=hp) * scale
        attn = jax.nn.softmax(dots, axis=-1)
        out = jnp.einsum("bhnm,bhmd->bhnd", attn, v, precision=hp)
        out = out.transpose(0, 2, 1, 3).reshape(B, N, heads * dim_head)
        x = x + (mm(out, p["wo_t"]) + p["bo"])
        x1n = _layer_norm(x, p["ln2_g"], p["ln2_b"])
        h1 = mm(x1n, p["w1_t"]) + p["b1"]
        x = x + (mm(_gelu_tanh(h1), p["w2_t"]) + p["b2"])
        feats.append(x)
    return feats


if __name__ == "__main__":
    key = jax.random.PRNGKey(0)
    kx, kp = jax.random.split(key)

    B, N, dim = 2, 8, 32
    heads, dim_head, mlp_dim, depth = 4, 8, 64, 2

    x = jax.random.normal(kx, (B, N, dim), dtype=jnp.float32)
    model = Transformer(dim, depth, heads, dim_head, mlp_dim, dropout=0.0, key=kp)

    feats = model(x)
    feats = [jax.block_until_ready(f) for f in feats]

    assert len(feats) == depth
    for f in feats:
        assert f.shape == (B, N, dim), f.shape

    refs = _reference(x, model.layers, heads, dim_head)
    for f, r in zip(feats, refs):
        err = float(jnp.max(jnp.abs(f - r)))
        assert jnp.allclose(f, r, atol=1e-4, rtol=1e-4), err

    print("KERNEL_OK")
</pallas_src>

<mosaic_0001>
module attributes {stable_mosaic.version = 11 : i64} {
  func.func @_block_kernel(%arg0: i32, %arg1: memref<1x8x32xf32, #tpu.memory_space<vmem>>, %arg2: memref<1x32xf32, #tpu.memory_space<vmem>>, %arg3: memref<1x32xf32, #tpu.memory_space<vmem>>, %arg4: memref<32x96xf32, #tpu.memory_space<vmem>>, %arg5: memref<32x32xf32, #tpu.memory_space<vmem>>, %arg6: memref<1x32xf32, #tpu.memory_space<vmem>>, %arg7: memref<1x32xf32, #tpu.memory_space<vmem>>, %arg8: memref<1x32xf32, #tpu.memory_space<vmem>>, %arg9: memref<32x64xf32, #tpu.memory_space<vmem>>, %arg10: memref<1x64xf32, #tpu.memory_space<vmem>>, %arg11: memref<64x32xf32, #tpu.memory_space<vmem>>, %arg12: memref<1x32xf32, #tpu.memory_space<vmem>>, %arg13: memref<1x8x32xf32, #tpu.memory_space<vmem>>) attributes {dimension_semantics = [#tpu.dimension_semantics<parallel>], iteration_bounds = array<i64: 2>, scalar_prefetch = 0 : i64, scratch_operands = 0 : i64, tpu.core_type = #tpu.core_type<tc>, window_params = [{transform_indices = @transform_0, window_bounds = array<i64: 1, 8, 32>}, {pipeline_mode = #tpu.pipeline_mode<synchronous>, transform_indices = @transform_1, window_bounds = array<i64: 1, 32>}, {pipeline_mode = #tpu.pipeline_mode<synchronous>, transform_indices = @transform_2, window_bounds = array<i64: 1, 32>}, {pipeline_mode = #tpu.pipeline_mode<synchronous>, transform_indices = @transform_3, window_bounds = array<i64: 32, 96>}, {pipeline_mode = #tpu.pipeline_mode<synchronous>, transform_indices = @transform_4, window_bounds = array<i64: 32, 32>}, {pipeline_mode = #tpu.pipeline_mode<synchronous>, transform_indices = @transform_5, window_bounds = array<i64: 1, 32>}, {pipeline_mode = #tpu.pipeline_mode<synchronous>, transform_indices = @transform_6, window_bounds = array<i64: 1, 32>}, {pipeline_mode = #tpu.pipeline_mode<synchronous>, transform_indices = @transform_7, window_bounds = array<i64: 1, 32>}, {pipeline_mode = #tpu.pipeline_mode<synchronous>, transform_indices = @transform_8, window_bounds = array<i64: 32, 64>}, {pipeline_mode = #tpu.pipeline_mode<synchronous>, transform_indices = @transform_9, window_bounds = array<i64: 1, 64>}, {pipeline_mode = #tpu.pipeline_mode<synchronous>, transform_indices = @transform_10, window_bounds = array<i64: 64, 32>}, {pipeline_mode = #tpu.pipeline_mode<synchronous>, transform_indices = @transform_11, window_bounds = array<i64: 1, 32>}, {transform_indices = @transform_12, window_bounds = array<i64: 1, 8, 32>}]} {
    %c0 = arith.constant 0 : index
    %c0_0 = arith.constant 0 : index
    %c0_1 = arith.constant 0 : index
    %0 = vector.load %arg1[%c0, %c0_0, %c0_1] : memref<1x8x32xf32, #tpu.memory_space<vmem>>, vector<1x8x32xf32>
    %1 = vector.shape_cast %0 : vector<1x8x32xf32> to vector<8x32xf32>
    %c0_2 = arith.constant 0 : index
    %c0_3 = arith.constant 0 : index
    %2 = vector.load %arg2[%c0_2, %c0_3] : memref<1x32xf32, #tpu.memory_space<vmem>>, vector<1x32xf32>
    %c0_4 = arith.constant 0 : index
    %c0_5 = arith.constant 0 : index
    %3 = vector.load %arg3[%c0_4, %c0_5] : memref<1x32xf32, #tpu.memory_space<vmem>>, vector<1x32xf32>
    %cst = arith.constant dense<0.000000e+00> : vector<8xf32>
    %4 = vector.multi_reduction <add>, %1, %cst [1] : vector<8x32xf32> to vector<8xf32>
    %5 = vector.shape_cast %4 : vector<8xf32> to vector<8x1xf32>
    %cst_6 = arith.constant 3.200000e+01 : f32
    %6 = vector.broadcast %cst_6 : f32 to vector<8x1xf32>
    %7 = arith.divf %5, %6 : vector<8x1xf32>
    %8 = vector.broadcast %7 : vector<8x1xf32> to vector<8x32xf32>
    %9 = arith.subf %1, %8 : vector<8x32xf32>
    %10 = arith.mulf %9, %9 : vector<8x32xf32>
    %cst_7 = arith.constant dense<0.000000e+00> : vector<8xf32>
    %11 = vector.multi_reduction <add>, %10, %cst_7 [1] : vector<8x32xf32> to vector<8xf32>
    %12 = vector.shape_cast %11 : vector<8xf32> to vector<8x1xf32>
    %cst_8 = arith.constant 3.200000e+01 : f32
    %13 = vector.broadcast %cst_8 : f32 to vector<8x1xf32>
    %14 = arith.divf %12, %13 : vector<8x1xf32>
    %15 = vector.broadcast %7 : vector<8x1xf32> to vector<8x32xf32>
    %16 = arith.subf %1, %15 : vector<8x32xf32>
    %cst_9 = arith.constant 9.99999974E-6 : f32
    %17 = vector.broadcast %cst_9 : f32 to vector<8x1xf32>
    %18 = arith.addf %14, %17 : vector<8x1xf32>
    %19 = math.rsqrt %18 : vector<8x1xf32>
    %20 = vector.broadcast %19 : vector<8x1xf32> to vector<8x32xf32>
    %21 = arith.mulf %16, %20 : vector<8x32xf32>
    %22 = vector.broadcast %2 : vector<1x32xf32> to vector<8x32xf32>
    %23 = arith.mulf %21, %22 : vector<8x32xf32>
    %24 = vector.broadcast %3 : vector<1x32xf32> to vector<8x32xf32>
    %25 = arith.addf %23, %24 : vector<8x32xf32>
    %c0_10 = arith.constant 0 : index
    %c0_11 = arith.constant 0 : index
    %26 = vector.load %arg4[%c0_10, %c0_11] : memref<32x96xf32, #tpu.memory_space<vmem>>, vector<32x96xf32>
    %cst_12 = arith.constant dense<0.000000e+00> : vector<8x96xf32>
    %27 = tpu.matmul %25, %26, %cst_12 {dimension_numbers = #tpu.dot_dimension_numbers<[1], [0], [0], [1], [0, 0, 1, 1], [], []>} : vector<8x32xf32>, vector<32x96xf32>, vector<8x96xf32> -> vector<8x96xf32>
    %cst_13 = arith.constant 0.000000e+00 : f32
    %28 = vector.broadcast %cst_13 : f32 to vector<8x32xf32>
    %29 = vector.extract_strided_slice %27 {offsets = [0, 0], sizes = [8, 8], strides = [1, 1]} : vector<8x96xf32> to vector<8x8xf32>
    %30 = vector.extract_strided_slice %27 {offsets = [0, 32], sizes = [8, 8], strides = [1, 1]} : vector<8x96xf32> to vector<8x8xf32>
    %31 = vector.extract_strided_slice %27 {offsets = [0, 64], sizes = [8, 8], strides = [1, 1]} : vector<8x96xf32> to vector<8x8xf32>
    %cst_14 = arith.constant dense<0.000000e+00> : vector<8x8xf32>
    %32 = tpu.matmul %29, %30, %cst_14 {dimension_numbers = #tpu.dot_dimension_numbers<[1], [1], [0], [0], [0, 0, 1, 0], [], []>} : vector<8x8xf32>, vector<8x8xf32>, vector<8x8xf32> -> vector<8x8xf32>
    %cst_15 = arith.constant 0.353553385 : f32
    %33 = vector.broadcast %cst_15 : f32 to vector<8x8xf32>
    %34 = arith.mulf %32, %33 : vector<8x8xf32>
    %cst_16 = arith.constant dense<0xFF800000> : vector<8xf32>
    %35 = vector.multi_reduction <maximumf>, %34, %cst_16 [1] : vector<8x8xf32> to vector<8xf32>
    %36 = vector.shape_cast %35 : vector<8xf32> to vector<8x1xf32>
    %37 = vector.broadcast %36 : vector<8x1xf32> to vector<8x8xf32>
    %38 = arith.subf %34, %37 : vector<8x8xf32>
    %39 = math.exp %38 : vector<8x8xf32>
    %cst_17 = arith.constant dense<0.000000e+00> : vector<8xf32>
    %40 = vector.multi_reduction <add>, %39, %cst_17 [1] : vector<8x8xf32> to vector<8xf32>
    %41 = vector.shape_cast %40 : vector<8xf32> to vector<8x1xf32>
    %42 = vector.broadcast %41 : vector<8x1xf32> to vector<8x8xf32>
    %43 = arith.divf %39, %42 : vector<8x8xf32>
    %cst_18 = arith.constant dense<0.000000e+00> : vector<8x8xf32>
    %44 = tpu.matmul %43, %31, %cst_18 {dimension_numbers = #tpu.dot_dimension_numbers<[1], [0], [0], [1], [0, 0, 1, 1], [], []>} : vector<8x8xf32>, vector<8x8xf32>, vector<8x8xf32> -> vector<8x8xf32>
    %c0_19 = arith.constant 0 : index
    %c0_20 = arith.constant 0 : index
    %45 = vector.load %arg5[%c0_19, %c0_20] : memref<32x32xf32, #tpu.memory_space<vmem>>, vector<8x32xf32>
    %cst_21 = arith.constant dense<0.000000e+00> : vector<8x32xf32>
    %46 = tpu.matmul %44, %45, %cst_21 {dimension_numbers = #tpu.dot_dimension_numbers<[1], [0], [0], [1], [0, 0, 1, 1], [], []>} : vector<8x8xf32>, vector<8x32xf32>, vector<8x32xf32> -> vector<8x32xf32>
    %47 = arith.addf %28, %46 : vector<8x32xf32>
    %48 = vector.extract_strided_slice %27 {offsets = [0, 8], sizes = [8, 8], strides = [1, 1]} : vector<8x96xf32> to vector<8x8xf32>
    %49 = vector.extract_strided_slice %27 {offsets = [0, 40], sizes = [8, 8], strides = [1, 1]} : vector<8x96xf32> to vector<8x8xf32>
    %50 = vector.extract_strided_slice %27 {offsets = [0, 72], sizes = [8, 8], strides = [1, 1]} : vector<8x96xf32> to vector<8x8xf32>
    %cst_22 = arith.constant dense<0.000000e+00> : vector<8x8xf32>
    %51 = tpu.matmul %48, %49, %cst_22 {dimension_numbers = #tpu.dot_dimension_numbers<[1], [1], [0], [0], [0, 0, 1, 0], [], []>} : vector<8x8xf32>, vector<8x8xf32>, vector<8x8xf32> -> vector<8x8xf32>
    %cst_23 = arith.constant 0.353553385 : f32
    %52 = vector.broadcast %cst_23 : f32 to vector<8x8xf32>
    %53 = arith.mulf %51, %52 : vector<8x8xf32>
    %cst_24 = arith.constant dense<0xFF800000> : vector<8xf32>
    %54 = vector.multi_reduction <maximumf>, %53, %cst_24 [1] : vector<8x8xf32> to vector<8xf32>
    %55 = vector.shape_cast %54 : vector<8xf32> to vector<8x1xf32>
    %56 = vector.broadcast %55 : vector<8x1xf32> to vector<8x8xf32>
    %57 = arith.subf %53, %56 : vector<8x8xf32>
    %58 = math.exp %57 : vector<8x8xf32>
    %cst_25 = arith.constant dense<0.000000e+00> : vector<8xf32>
    %59 = vector.multi_reduction <add>, %58, %cst_25 [1] : vector<8x8xf32> to vector<8xf32>
    %60 = vector.shape_cast %59 : vector<8xf32> to vector<8x1xf32>
    %61 = vector.broadcast %60 : vector<8x1xf32> to vector<8x8xf32>
    %62 = arith.divf %58, %61 : vector<8x8xf32>
    %cst_26 = arith.constant dense<0.000000e+00> : vector<8x8xf32>
    %63 = tpu.matmul %62, %50, %cst_26 {dimension_numbers = #tpu.dot_dimension_numbers<[1], [0], [0], [1], [0, 0, 1, 1], [], []>} : vector<8x8xf32>, vector<8x8xf32>, vector<8x8xf32> -> vector<8x8xf32>
    %c8 = arith.constant 8 : index
    %c0_27 = arith.constant 0 : index
    %64 = vector.load %arg5[%c8, %c0_27] : memref<32x32xf32, #tpu.memory_space<vmem>>, vector<8x32xf32>
    %cst_28 = arith.constant dense<0.000000e+00> : vector<8x32xf32>
    %65 = tpu.matmul %63, %64, %cst_28 {dimension_numbers = #tpu.dot_dimension_numbers<[1], [0], [0], [1], [0, 0, 1, 1], [], []>} : vector<8x8xf32>, vector<8x32xf32>, vector<8x32xf32> -> vector<8x32xf32>
    %66 = arith.addf %47, %65 : vector<8x32xf32>
    %67 = vector.extract_strided_slice %27 {offsets = [0, 16], sizes = [8, 8], strides = [1, 1]} : vector<8x96xf32> to vector<8x8xf32>
    %68 = vector.extract_strided_slice %27 {offsets = [0, 48], sizes = [8, 8], strides = [1, 1]} : vector<8x96xf32> to vector<8x8xf32>
    %69 = vector.extract_strided_slice %27 {offsets = [0, 80], sizes = [8, 8], strides = [1, 1]} : vector<8x96xf32> to vector<8x8xf32>
    %cst_29 = arith.constant dense<0.000000e+00> : vector<8x8xf32>
    %70 = tpu.matmul %67, %68, %cst_29 {dimension_numbers = #tpu.dot_dimension_numbers<[1], [1], [0], [0], [0, 0, 1, 0], [], []>} : vector<8x8xf32>, vector<8x8xf32>, vector<8x8xf32> -> vector<8x8xf32>
    %cst_30 = arith.constant 0.353553385 : f32
    %71 = vector.broadcast %cst_30 : f32 to vector<8x8xf32>
    %72 = arith.mulf %70, %71 : vector<8x8xf32>
    %cst_31 = arith.constant dense<0xFF800000> : vector<8xf32>
    %73 = vector.multi_reduction <maximumf>, %72, %cst_31 [1] : vector<8x8xf32> to vector<8xf32>
    %74 = vector.shape_cast %73 : vector<8xf32> to vector<8x1xf32>
    %75 = vector.broadcast %74 : vector<8x1xf32> to vector<8x8xf32>
    %76 = arith.subf %72, %75 : vector<8x8xf32>
    %77 = math.exp %76 : vector<8x8xf32>
    %cst_32 = arith.constant dense<0.000000e+00> : vector<8xf32>
    %78 = vector.multi_reduction <add>, %77, %cst_32 [1] : vector<8x8xf32> to vector<8xf32>
    %79 = vector.shape_cast %78 : vector<8xf32> to vector<8x1xf32>
    %80 = vector.broadcast %79 : vector<8x1xf32> to vector<8x8xf32>
    %81 = arith.divf %77, %80 : vector<8x8xf32>
    %cst_33 = arith.constant dense<0.000000e+00> : vector<8x8xf32>
    %82 = tpu.matmul %81, %69, %cst_33 {dimension_numbers = #tpu.dot_dimension_numbers<[1], [0], [0], [1], [0, 0, 1, 1], [], []>} : vector<8x8xf32>, vector<8x8xf32>, vector<8x8xf32> -> vector<8x8xf32>
    %c16 = arith.constant 16 : index
    %c0_34 = arith.constant 0 : index
    %83 = vector.load %arg5[%c16, %c0_34] : memref<32x32xf32, #tpu.memory_space<vmem>>, vector<8x32xf32>
    %cst_35 = arith.constant dense<0.000000e+00> : vector<8x32xf32>
    %84 = tpu.matmul %82, %83, %cst_35 {dimension_numbers = #tpu.dot_dimension_numbers<[1], [0], [0], [1], [0, 0, 1, 1], [], []>} : vector<8x8xf32>, vector<8x32xf32>, vector<8x32xf32> -> vector<8x32xf32>
    %85 = arith.addf %66, %84 : vector<8x32xf32>
    %86 = vector.extract_strided_slice %27 {offsets = [0, 24], sizes = [8, 8], strides = [1, 1]} : vector<8x96xf32> to vector<8x8xf32>
    %87 = vector.extract_strided_slice %27 {offsets = [0, 56], sizes = [8, 8], strides = [1, 1]} : vector<8x96xf32> to vector<8x8xf32>
    %88 = vector.extract_strided_slice %27 {offsets = [0, 88], sizes = [8, 8], strides = [1, 1]} : vector<8x96xf32> to vector<8x8xf32>
    %cst_36 = arith.constant dense<0.000000e+00> : vector<8x8xf32>
    %89 = tpu.matmul %86, %87, %cst_36 {dimension_numbers = #tpu.dot_dimension_numbers<[1], [1], [0], [0], [0, 0, 1, 0], [], []>} : vector<8x8xf32>, vector<8x8xf32>, vector<8x8xf32> -> vector<8x8xf32>
    %cst_37 = arith.constant 0.353553385 : f32
    %90 = vector.broadcast %cst_37 : f32 to vector<8x8xf32>
    %91 = arith.mulf %89, %90 : vector<8x8xf32>
    %cst_38 = arith.constant dense<0xFF800000> : vector<8xf32>
    %92 = vector.multi_reduction <maximumf>, %91, %cst_38 [1] : vector<8x8xf32> to vector<8xf32>
    %93 = vector.shape_cast %92 : vector<8xf32> to vector<8x1xf32>
    %94 = vector.broadcast %93 : vector<8x1xf32> to vector<8x8xf32>
    %95 = arith.subf %91, %94 : vector<8x8xf32>
    %96 = math.exp %95 : vector<8x8xf32>
    %cst_39 = arith.constant dense<0.000000e+00> : vector<8xf32>
    %97 = vector.multi_reduction <add>, %96, %cst_39 [1] : vector<8x8xf32> to vector<8xf32>
    %98 = vector.shape_cast %97 : vector<8xf32> to vector<8x1xf32>
    %99 = vector.broadcast %98 : vector<8x1xf32> to vector<8x8xf32>
    %100 = arith.divf %96, %99 : vector<8x8xf32>
    %cst_40 = arith.constant dense<0.000000e+00> : vector<8x8xf32>
    %101 = tpu.matmul %100, %88, %cst_40 {dimension_numbers = #tpu.dot_dimension_numbers<[1], [0], [0], [1], [0, 0, 1, 1], [], []>} : vector<8x8xf32>, vector<8x8xf32>, vector<8x8xf32> -> vector<8x8xf32>
    %c24 = arith.constant 24 : index
    %c0_41 = arith.constant 0 : index
    %102 = vector.load %arg5[%c24, %c0_41] : memref<32x32xf32, #tpu.memory_space<vmem>>, vector<8x32xf32>
    %cst_42 = arith.constant dense<0.000000e+00> : vector<8x32xf32>
    %103 = tpu.matmul %101, %102, %cst_42 {dimension_numbers = #tpu.dot_dimension_numbers<[1], [0], [0], [1], [0, 0, 1, 1], [], []>} : vector<8x8xf32>, vector<8x32xf32>, vector<8x32xf32> -> vector<8x32xf32>
    %104 = arith.addf %85, %103 : vector<8x32xf32>
    %c0_43 = arith.constant 0 : index
    %c0_44 = arith.constant 0 : index
    %105 = vector.load %arg6[%c0_43, %c0_44] : memref<1x32xf32, #tpu.memory_space<vmem>>, vector<1x32xf32>
    %106 = vector.broadcast %105 : vector<1x32xf32> to vector<8x32xf32>
    %107 = arith.addf %104, %106 : vector<8x32xf32>
    %108 = arith.addf %1, %107 : vector<8x32xf32>
    %c0_45 = arith.constant 0 : index
    %c0_46 = arith.constant 0 : index
    %109 = vector.load %arg7[%c0_45, %c0_46] : memref<1x32xf32, #tpu.memory_space<vmem>>, vector<1x32xf32>
    %c0_47 = arith.constant 0 : index
    %c0_48 = arith.constant 0 : index
    %110 = vector.load %arg8[%c0_47, %c0_48] : memref<1x32xf32, #tpu.memory_space<vmem>>, vector<1x32xf32>
    %cst_49 = arith.constant dense<0.000000e+00> : vector<8xf32>
    %111 = vector.multi_reduction <add>, %108, %cst_49 [1] : vector<8x32xf32> to vector<8xf32>
    %112 = vector.shape_cast %111 : vector<8xf32> to vector<8x1xf32>
    %cst_50 = arith.constant 3.200000e+01 : f32
    %113 = vector.broadcast %cst_50 : f32 to vector<8x1xf32>
    %114 = arith.divf %112, %113 : vector<8x1xf32>
    %115 = vector.broadcast %114 : vector<8x1xf32> to vector<8x32xf32>
    %116 = arith.subf %108, %115 : vector<8x32xf32>
    %117 = arith.mulf %116, %116 : vector<8x32xf32>
    %cst_51 = arith.constant dense<0.000000e+00> : vector<8xf32>
    %118 = vector.multi_reduction <add>, %117, %cst_51 [1] : vector<8x32xf32> to vector<8xf32>
    %119 = vector.shape_cast %118 : vector<8xf32> to vector<8x1xf32>
    %cst_52 = arith.constant 3.200000e+01 : f32
    %120 = vector.broadcast %cst_52 : f32 to vector<8x1xf32>
    %121 = arith.divf %119, %120 : vector<8x1xf32>
    %122 = vector.broadcast %114 : vector<8x1xf32> to vector<8x32xf32>
    %123 = arith.subf %108, %122 : vector<8x32xf32>
    %cst_53 = arith.constant 9.99999974E-6 : f32
    %124 = vector.broadcast %cst_53 : f32 to vector<8x1xf32>
    %125 = arith.addf %121, %124 : vector<8x1xf32>
    %126 = math.rsqrt %125 : vector<8x1xf32>
    %127 = vector.broadcast %126 : vector<8x1xf32> to vector<8x32xf32>
    %128 = arith.mulf %123, %127 : vector<8x32xf32>
    %129 = vector.broadcast %109 : vector<1x32xf32> to vector<8x32xf32>
    %130 = arith.mulf %128, %129 : vector<8x32xf32>
    %131 = vector.broadcast %110 : vector<1x32xf32> to vector<8x32xf32>
    %132 = arith.addf %130, %131 : vector<8x32xf32>
    %c0_54 = arith.constant 0 : index
    %c0_55 = arith.constant 0 : index
    %133 = vector.load %arg9[%c0_54, %c0_55] : memref<32x64xf32, #tpu.memory_space<vmem>>, vector<32x64xf32>
    %cst_56 = arith.constant dense<0.000000e+00> : vector<8x64xf32>
    %134 = tpu.matmul %132, %133, %cst_56 {dimension_numbers = #tpu.dot_dimension_numbers<[1], [0], [0], [1], [0, 0, 1, 1], [], []>} : vector<8x32xf32>, vector<32x64xf32>, vector<8x64xf32> -> vector<8x64xf32>
    %c0_57 = arith.constant 0 : index
    %c0_58 = arith.constant 0 : index
    %135 = vector.load %arg10[%c0_57, %c0_58] : memref<1x64xf32, #tpu.memory_space<vmem>>, vector<1x64xf32>
    %136 = vector.broadcast %135 : vector<1x64xf32> to vector<8x64xf32>
    %137 = arith.addf %134, %136 : vector<8x64xf32>
    %cst_59 = arith.constant 5.000000e-01 : f32
    %138 = vector.broadcast %cst_59 : f32 to vector<8x64xf32>
    %139 = arith.mulf %138, %137 : vector<8x64xf32>
    %cst_60 = arith.constant 4.471500e-02 : f32
    %140 = vector.broadcast %cst_60 : f32 to vector<8x64xf32>
    %141 = arith.mulf %140, %137 : vector<8x64xf32>
    %142 = arith.mulf %141, %137 : vector<8x64xf32>
    %143 = arith.mulf %142, %137 : vector<8x64xf32>
    %144 = arith.addf %137, %143 : vector<8x64xf32>
    %cst_61 = arith.constant 0.797884583 : f32
    %145 = vector.broadcast %cst_61 : f32 to vector<8x64xf32>
    %146 = arith.mulf %145, %144 : vector<8x64xf32>
    %147 = math.tanh %146 : vector<8x64xf32>
    %cst_62 = arith.constant 1.000000e+00 : f32
    %148 = vector.broadcast %cst_62 : f32 to vector<8x64xf32>
    %149 = arith.addf %148, %147 : vector<8x64xf32>
    %150 = arith.mulf %139, %149 : vector<8x64xf32>
    %c0_63 = arith.constant 0 : index
    %c0_64 = arith.constant 0 : index
    %151 = vector.load %arg11[%c0_63, %c0_64] : memref<64x32xf32, #tpu.memory_space<vmem>>, vector<64x32xf32>
    %cst_65 = arith.constant dense<0.000000e+00> : vector<8x32xf32>
    %152 = tpu.matmul %150, %151, %cst_65 {dimension_numbers = #tpu.dot_dimension_numbers<[1], [0], [0], [1], [0, 0, 1, 1], [], []>} : vector<8x64xf32>, vector<64x32xf32>, vector<8x32xf32> -> vector<8x32xf32>
    %c0_66 = arith.constant 0 : index
    %c0_67 = arith.constant 0 : index
    %153 = vector.load %arg12[%c0_66, %c0_67] : memref<1x32xf32, #tpu.memory_space<vmem>>, vector<1x32xf32>
    %154 = vector.broadcast %153 : vector<1x32xf32> to vector<8x32xf32>
    %155 = arith.addf %152, %154 : vector<8x32xf32>
    %156 = arith.addf %108, %155 : vector<8x32xf32>
    %c0_68 = arith.constant 0 : index
    %c0_69 = arith.constant 0 : index
    %c0_70 = arith.constant 0 : index
    %157 = vector.load %arg13[%c0_68, %c0_69, %c0_70] : memref<1x8x32xf32, #tpu.memory_space<vmem>>, vector<1x8x32xf32>
    %158 = vector.shape_cast %157 : vector<1x8x32xf32> to vector<8x32xf32>
    %159 = vector.shape_cast %156 : vector<8x32xf32> to vector<1x8x32xf32>
    tpu.vector_store %arg13[%c0_68, %c0_69, %c0_70], %159 {strides = array<i32>} : memref<1x8x32xf32, #tpu.memory_space<vmem>>, vector<1x8x32xf32>,
    return
  }
  func.func @transform_0(%arg0: i32) -> (i32, i32, i32) {
    %c0_i32 = arith.constant 0 : i32
    %c0_i32_0 = arith.constant 0 : i32
    %c0_i32_1 = arith.constant 0 : i32
    return %arg0, %c0_i32, %c0_i32_0 : i32, i32, i32
  }
  func.func @transform_1(%arg0: i32) -> (i32, i32) {
    %c0_i32 = arith.constant 0 : i32
    %c0_i32_0 = arith.constant 0 : i32
    %c0_i32_1 = arith.constant 0 : i32
    return %c0_i32, %c0_i32_0 : i32, i32
  }
  func.func @transform_2(%arg0: i32) -> (i32, i32) {
    %c0_i32 = arith.constant 0 : i32
    %c0_i32_0 = arith.constant 0 : i32
    %c0_i32_1 = arith.constant 0 : i32
    return %c0_i32, %c0_i32_0 : i32, i32
  }
  func.func @transform_3(%arg0: i32) -> (i32, i32) {
    %c0_i32 = arith.constant 0 : i32
    %c0_i32_0 = arith.constant 0 : i32
    %c0_i32_1 = arith.constant 0 : i32
    return %c0_i32, %c0_i32_0 : i32, i32
  }
  func.func @transform_4(%arg0: i32) -> (i32, i32) {
    %c0_i32 = arith.constant 0 : i32
    %c0_i32_0 = arith.constant 0 : i32
    %c0_i32_1 = arith.constant 0 : i32
    return %c0_i32, %c0_i32_0 : i32, i32
  }
  func.func @transform_5(%arg0: i32) -> (i32, i32) {
    %c0_i32 = arith.constant 0 : i32
    %c0_i32_0 = arith.constant 0 : i32
    %c0_i32_1 = arith.constant 0 : i32
    return %c0_i32, %c0_i32_0 : i32, i32
  }
  func.func @transform_6(%arg0: i32) -> (i32, i32) {
    %c0_i32 = arith.constant 0 : i32
    %c0_i32_0 = arith.constant 0 : i32
    %c0_i32_1 = arith.constant 0 : i32
    return %c0_i32, %c0_i32_0 : i32, i32
  }
  func.func @transform_7(%arg0: i32) -> (i32, i32) {
    %c0_i32 = arith.constant 0 : i32
    %c0_i32_0 = arith.constant 0 : i32
    %c0_i32_1 = arith.constant 0 : i32
    return %c0_i32, %c0_i32_0 : i32, i32
  }
  func.func @transform_8(%arg0: i32) -> (i32, i32) {
    %c0_i32 = arith.constant 0 : i32
    %c0_i32_0 = arith.constant 0 : i32
    %c0_i32_1 = arith.constant 0 : i32
    return %c0_i32, %c0_i32_0 : i32, i32
  }
  func.func @transform_9(%arg0: i32) -> (i32, i32) {
    %c0_i32 = arith.constant 0 : i32
    %c0_i32_0 = arith.constant 0 : i32
    %c0_i32_1 = arith.constant 0 : i32
    return %c0_i32, %c0_i32_0 : i32, i32
  }
  func.func @transform_10(%arg0: i32) -> (i32, i32) {
    %c0_i32 = arith.constant 0 : i32
    %c0_i32_0 = arith.constant 0 : i32
    %c0_i32_1 = arith.constant 0 : i32
    return %c0_i32, %c0_i32_0 : i32, i32
  }
  func.func @transform_11(%arg0: i32) -> (i32, i32) {
    %c0_i32 = arith.constant 0 : i32
    %c0_i32_0 = arith.constant 0 : i32
    %c0_i32_1 = arith.constant 0 : i32
    return %c0_i32, %c0_i32_0 : i32, i32
  }
  func.func @transform_12(%arg0: i32) -> (i32, i32, i32) {
    %c0_i32 = arith.constant 0 : i32
    %c0_i32_0 = arith.constant 0 : i32
    %c0_i32_1 = arith.constant 0 : i32
    return %arg0, %c0_i32, %c0_i32_0 : i32, i32, i32
  }
}

</mosaic_0001>

<bundles_post_ra>
// kernel: tpu_custom_call.1
= control target key start
LH: loop header
LB: loop body
LE: loop exit
PB: predicated region body
PF: predicated region fallthrough
CT: control target
= control target key end

     0   :  { %s1775_s0 = inlined_call_operand.hbm [shape: f32[2,8,32], index: 0, kind: input, shape index: {}]   ;;  %s1776_s1 = inlined_call_operand.hbm [shape: f32[1,32], index: 1, kind: input, shape index: {}]   ;;  %s1777_s2 = inlined_call_operand.vmem [shape: f32[1,32], index: 2, kind: input, shape index: {}]   ;;  %s1778_s3 = inlined_call_operand.vmem [shape: f32[32,96], index: 3, kind: input, shape index: {}]   ;;  %s1779_s4 = inlined_call_operand.vmem [shape: f32[32,32], index: 4, kind: input, shape index: {}]   ;;  %s1780_s5 = inlined_call_operand.vmem [shape: f32[1,32], index: 5, kind: input, shape index: {}]   ;;  %s1781_s6 = inlined_call_operand.vmem [shape: f32[1,32], index: 6, kind: input, shape index: {}]   ;;  %s1782_s7 = inlined_call_operand.vmem [shape: f32[1,32], index: 7, kind: input, shape index: {}]   ;;  %s1783_s8 = inlined_call_operand.vmem [shape: f32[32,64], index: 8, kind: input, shape index: {}]   ;;  %s1784_s9 = inlined_call_operand.vmem [shape: f32[1,64], index: 9, kind: input, shape index: {}]   ;;  %s1785_s10 = inlined_call_operand.vmem [shape: f32[64,32], index: 10, kind: input, shape index: {}]   ;;  %s1786_s11 = inlined_call_operand.vmem [shape: f32[1,32], index: 11, kind: input, shape index: {}]   ;;  %s1787_s12 = inlined_call_operand.hbm [shape: f32[2,8,32], index: 12, kind: output, shape index: {}]  }
   0x1   :  { %1793 = sst [smem:[#allocation16_spill]] %s1776_s1 }
   0x2   :  { %17 = vsyncpa [#allocation3], 0 }
   0x3   :  { %19 = vsyncpa [#allocation3 + $0x1], 0 }
   0x4   :  { %20 = vsyncpa [#allocation6], 0 }
   0x5   :  { %21 = vsyncpa [#allocation4], 0 }
   0x6   :  { %23 = vsyncpa [#allocation4 + $0x1], 0  ;;  %s1483_s21 = smov 0   ;;  %s1485_s22 = smov 0  }
   0x7   :  { %s1487_s23 = smov 0   ;;  %s1489_s24 = smov 0  }
   0x8 LB: > { %1794 = sst [smem:[#allocation11_spill]] %s1391_s21  ;;  %s1504_s25 = sadd.s32 4294967295, %s1403_s24   ;;  %s1403_s24 = sphi %s1489_s24, %s1808_s24   ;;  %s1399_s23 = sphi %s1487_s23, %s1810_s23   ;;  %s1395_s22 = sphi %s1485_s22, %s1812_s22   ;;  %s1391_s21 = sphi %s1483_s21, %s1811_s21  }
   0x9   : > { %1795 = sst [smem:[#allocation12_spill]] %s1399_s23  ;;  %s1140_s26 = sadd.s32 4294967294, %s1403_s24  }
   0xa   : > { %p49_p0 = scmp.ne.s32.totalorder %s1395_s22, %s1391_s21  ;;  %p50_p1 = scmp.eq.s32.totalorder %s1504_s25, 0 }
   0xb   : > { %p304_p2 = scmp.eq.s32.totalorder %s1504_s25, 1  ;;  %p310_p3 = scmp.eq.s32.totalorder %s1140_s26, 1 }
   0xc   : > { %p1513_p4 = por %p50_p1, %p49_p0  ;;  %p1141_p5 = scmp.ge.s32.totalorder %s1403_s24, 1 }
   0xd   : > { %p1518_p6 = por %p310_p3, %p49_p0  ;;  %p317_p7 = scmp.lt.s32.totalorder %s1403_s24, 3 }
   0xe   : > { %s1799_s1 = sld [smem:[#allocation16_spill]]  ;;  %s1405_s15 = smov [#allocation5]  }
   0xf   : > { %s1797_s28 = scalar_select %p1518_p6, 1, 0 }
  0x10   : > { %p1526_p8 = pnand %p1141_p5, %p317_p7  ;;  %s331_s16 = sshll.u32 %s1405_s15, 4  ;;  %s332_s16 = int_to_ptr.vmem [resolvable:$true] %s331_s16 }
  0x11   : > { %1798 = sst [smem:[#allocation13_spill]] %s1797_s28  ;;  %s1536_s17 = sadd.s32 1, %s1403_s24  }
  0x12   : > { %p1181_p10 = pneg %p1526_p8  ;;  %1801 = sst [smem:[#allocation14_spill]] %s1536_s17 }
  0x13   : > { %s36_s18 = sadd.s32 1, %s1399_s23  ;;  %s33_s19 = ssub.s32 %s1403_s24, %s1536_s17 }
  0x14   : > { %s329_s13 = sshll.u32 %s1799_s1, 4  ;;  %p1182_p11 = pnand %p1181_p10, %p50_p1  ;;  %s330_s13 = int_to_ptr.hbm [resolvable:$true] %s329_s13 }
  0x15   : > { %p34_p12 = scmp.eq.s32.totalorder %s33_s19, 0  ;;  %p43_p13 = scmp.ne.s32.totalorder %s1399_s23, %s1395_s22 }
  0x16   : > { %1184 = dma.hbm_to_vmem [thread:$0]  (!%p1182_p11), %s330_s13, 16, %s332_s16, [#allocation6]  }
  0x17   : > { %p44_p0 = scmp.eq.s32.totalorder %s1403_s24, 0  ;;  %p1549_p3 = por %p304_p2, %p43_p13 }
  0x18   : > { %s1545_s20 = scalar_select %p34_p12, %s1399_s23, %s36_s18  }
  0x19   : > { %p1194_p5 = scmp.lt.s32.totalorder %s1403_s24, 2  ;;  %s372_s29 = sand.u32 1, %s1399_s23  }
  0x1a   : > { %1802 = sst [smem:[#allocation15_spill]] %s1545_s20  ;;  %s1145_s30 = sshll.u32 %s1403_s24, 3 }
  0x1b   : > { %p45_p7 = por %p44_p0, %p43_p13  ;;  %s1144_s15 = sshll.u32 %s372_s29, 3 }
  0x1c   : > { %s380_s17 = scalar_lea.hbm %s1775_s0, %s1145_s30  ;;  %s376_s16 = scalar_lea.vmem [#allocation2], %s1144_s15 }
  0x1d   : > { %s382_s13 = sshll.u32 %s380_s17, 4  ;;  %s384_s19 = sshll.u32 %s376_s16, 4  ;;  %s383_s13 = int_to_ptr.hbm [resolvable:$true] %s382_s13  ;;  %s385_s19 = int_to_ptr.vmem [resolvable:$true] %s384_s19 }
  0x1e   : > { %p1559_p10 = pnand %p1194_p5, %p45_p7  ;;  %s373_s20 = scalar_lea.sflag [#allocation3], %s372_s29 }
  0x1f   : > { %s1303_s21 = sshra.s32 %s383_s13, 4  ;;  %s1310_s17 = scalar_lea.hbm %s1775_s0, 16  ;;  %s1304_s21 = int_to_ptr.hbm [resolvable:$true] %s1303_s21 }
  0x20   : > { %s1305_s23 = scalar_lea.hbm %s1304_s21, 8  ;;  %p1307_p11 = pneg %p1559_p10 }
  0x21   : > { %p1306_p2 = scmp.ne.s32.totalorder %s1304_s21, %s1305_s23  ;;  %p1311_p0 = scmp.lt.s32.totalorder %s1304_s21, %s1775_s0 }
  0x22   : > { %p1312_p5 = scmp.lt.s32.totalorder %s1310_s17, %s1305_s23 }
  0x23   : > { %p1308_p12 = pnand %p1307_p11, %p1306_p2 }
  0x24   : > { %p1313_p7 = por %p1312_p5, %p1311_p0 }
  0x25   : > { %p1309_p13 = pneg %p1308_p12 }
  0x27   : > { %p1314_p9 = pnand %p1313_p7, %p1309_p13 }
  0x29   : > { %1317 = shalt.err (!%p1314_p9)
}
  0x2a   : > { %1188 = dma.hbm_to_vmem [thread:$0]  (!%p1559_p10), %s383_s13, 128, %s385_s19, %s373_s20  }
  0x2b   : > { %393 = sbr.rel (%p1526_p8) target bundleno = 2330 (0x91a), region = 68  ;;  %s1576_s29 = sand.u32 (!%p1526_p8), 1, %s1395_s22  }
  0x2c   : > { %s1147_s16 = sshll.u32 (!%p1526_p8), %s1576_s29, 3  ;;  %s396_s1 = scalar_lea.sflag (!%p1526_p8), [#allocation3], %s1576_s29 }
  0x2d   : > { %s399_s21 = scalar_lea.vmem (!%p1526_p8), [#allocation2], %s1147_s16 }
  0x30   : > { %1378 = dma.done.wait (%p1513_p4), %s396_s1, 128  }
  0x31   : > { %1380 = vsyncadd (%p1513_p4), %s396_s1, 4294967168 }
  0x32   : > { %1382 = dma.done.wait (%p50_p1), [#allocation6], 16  }
  0x33   : > { %1384 = vsyncadd (%p50_p1), [#allocation6], 4294967280  ;;  %vm449_vm0 = vcmask 261120   ;;  %v1590_v0 = vld [vmem:[%s399_s21] sm:$0xff]  ;;  %v1406_v2 = vmov 32.0   ;;  %v490_v14 = vld [vmem:[%s1778_s3 + $0x18] sm:$0xff] }
  0x34   : > { %v450_v1 = vsel %vm449_vm0, %v1590_v0, 0.0  ;;  %1249 = vrcp.f32 %v1406_v2  ;;  %506 = vmatpush.msra.mxu0 %v490_v14  ;;  %v489_v15 = vld [vmem:[%s1778_s3 + $0x10] sm:$0xff]  ;;  %v488_v16 = vld [vmem:[%s1778_s3 + $0x8] sm:$0xff]  ;;  %v487_v17 = vld [vmem:[%s1778_s3] sm:$0xff]  ;;  %s1407_s15 = smov 88   ;;  %s1408_s1 = smov 96  }
  0x35   : > { %451 = vadd.xlane.f32.xlu0 %v450_v1  ;;  %v1242_v27 = vld [vmem:[#allocation5] ss:$0 sm:$0xff]  ;;  %v1243_v30 = vld [vmem:[%s1777_s2] ss:$0 sm:$0xff]  ;;  %s1409_s21 = smov 72   ;;  %s1410_s23 = smov 80  }
  0x36   : > { %507 = vmatpush.msra.mxu0 %v489_v15  ;;  %v593_v34 = vld [vmem:[%s1779_s4] sm:$0xff]  ;;  %vm517_vm5 = vcmask 64512   ;;  %s1411_s20 = smov 64   ;;  %s1412_s13 = smov 120  }
  0x37   : > { %715 = vmatpush.msra.mxu3 %v593_v34  ;;  %s1413_s19 = smov 104   ;;  %s1414_s18 = smov 112  }
  0x38   : > { %508 = vmatpush.msra.mxu0 %v488_v16  ;;  %s1415_s28 = smov 48   ;;  %s1416_s17 = smov 40  }
  0x39   : > { %s1417_s30 = smov 56   ;;  %s445_s14 = scalar_lea.vmem [#allocation7], %s1147_s16 }
  0x3a   : > { %v1250_v3 = vpop.eup %1249  ;;  %509 = vmatpush.msra.mxu0 %v487_v17  ;;  %s1353_s16 = scalar_lea.hbm %s1787_s12, 16 }
  0x3b   : > { %v454_v4 = vmul.f32 32.0, %v1250_v3  ;;  %vm458_vm1 = vweird.f32 %v1250_v3 }
  0x3d   : > { %v455_v5 = vsub.f32 1.0, %v454_v4 }
  0x3f   : > { %v456_v6 = vmul.f32 %v1250_v3, %v455_v5 }
  0x41   : > { %v457_v7 = vadd.f32 %v1250_v3, %v456_v6 }
  0x43   : > { %v1594_v8 = vsel %vm458_vm1, %v1250_v3, %v457_v7 }
  0xa8   : > { %v452_v9 = vpop.xlane.xlu0 %451 }
  0xa9   : > { %v460_v10 = vmul.f32 %v1594_v8, %v452_v9 }
  0xab   : > { %v461_v11 = vsub.f32 %v1590_v0, %v460_v10 }
  0xad   : > { %v462_v12 = vmul.f32 %v461_v11, %v461_v11 }
  0xaf   : > { %v463_v13 = vsel %vm449_vm0, %v462_v12, 0.0 }
  0xb0   : > { %464 = vadd.xlane.f32.xlu0 %v463_v13 }
 0x123   : > { %v465_v18 = vpop.xlane.xlu0 %464 }
 0x124   : > { %v466_v19 = vmul.f32 %v465_v18, %v1594_v8 }
 0x126   : > { %v467_v20 = vadd.f32 1e-05, %v466_v19 }
 0x128   : > { %1251 = vrsqrt.f32 %v467_v20  ;;  %vm474_vm3 = vweird.f32 %v467_v20 }
 0x12e   : > { %v1252_v21 = vpop.eup %1251 }
 0x12f   : > { %v469_v22 = vmul.f32 %v1252_v21, %v467_v20  ;;  %vm475_vm2 = vweird.f32 %v1252_v21 }
 0x130   : > { %vm476_vm4 = vmor %vm474_vm3, %vm475_vm2 }
 0x131   : > { %v470_v23 = vmul.f32 %v1252_v21, %v469_v22 }
 0x133   : > { %v471_v24 = vmul.f32 0.5, %v470_v23 }
 0x135   : > { %v472_v25 = vsub.f32 1.5, %v471_v24 }
 0x137   : > { %v473_v26 = vmul.f32 %v1252_v21, %v472_v25 }
 0x139   : > { %v477_v28 = vsel %vm476_vm4, %v1252_v21, %v473_v26 }
 0x13a   : > { %v478_v29 = vmul.f32 %v477_v28, %v461_v11 }
 0x13c   : > { %v482_v31 = vmul.f32 %v1242_v27, %v478_v29 }
 0x13e   : > { %v486_v32 = vadd.f32 %v1243_v30, %v482_v31 }
 0x140   : > { %1150 = vmatmul.msk.f32.vlgmr.msra.gmra.mxu0 %vm449_vm0, %v486_v32 }
 0x1bd   : > { %v1616_v33 = vpop.f32.mrf.mxu0 }
 0x1be   : > { %596 = vrot.lane.b32.xlu0 %v1616_v33, %s1407_s15  ;;  %515 = vrot.lane.b32.xlu1 %v1616_v33, %s1408_s1 }
 0x1c6   : > { %826 = vrot.lane.b32.xlu0 %v1616_v33, %s1409_s21 }
 0x1ce   : > { %722 = vrot.lane.b32.xlu0 %v1616_v33, %s1410_s23 }
 0x230   : > { %v597_v35 = vpop.permute.xlu0 %596  ;;  %v516_v36 = vpop.permute.xlu1 %515 }
 0x231   : > { %1151 = vmatpush.xpose.msk.msra.mxu1 %vm517_vm5, %v516_v36  ;;  %1154 = vmatpush.xpose.msk.msrb.mxu0 %vm517_vm5, %v597_v35 }
 0x234   : > { %1152 = vmatmul.msk.f32.vlgmr.msra.gmra.mxu1 %vm517_vm5, %v1616_v33 }
 0x238   : > { %v827_v37 = vpop.permute.xlu0 %826 }
 0x239   : > { %1163 = vmatpush.xpose.msk.msrb.mxu3 %vm517_vm5, %v827_v37 }
 0x240   : > { %v723_v38 = vpop.permute.xlu0 %722 }
 0x241   : > { %1159 = vmatpush.xpose.msk.msra.mxu0 %vm517_vm5, %v723_v38 }
 0x2b1   : > { %v539_v39 = vpop.f32.mrf.mxu1 }
 0x2b2   : > { %v542_v40 = vmul.f32 0.35355338, %v539_v39 }
 0x2b4   : > { %v543_v41 = vsel %vm517_vm5, %v542_v40, -inf }
 0x2b5   : > { %544 = vmax.xlane.f32.xlu1 %v543_v41 }
 0x328   : > { %v545_v42 = vpop.xlane.xlu1 %544 }
 0x329   : > { %v546_v43 = vsub.f32 %v542_v40, %v545_v42 }
 0x32b   : > { %v547_v44 = vmul.f32 1.442695, %v546_v43 }
 0x32d   : > { %1253 = vpow2.f32 %v547_v44 }
 0x333   : > { %v1254_v45 = vpop.eup %1253 }
 0x334   : > { %v549_v46 = vsel %vm517_vm5, %v1254_v45, 0.0 }
 0x335   : > { %550 = vadd.xlane.f32.xlu2 %v549_v46 }
 0x34d   : > { %567 = vrot.lane.b32.xlu2 %v1616_v33, %s1411_s20  ;;  %s1057_s20 = sshll.u32 %s445_s14, 4  ;;  %s1058_s20 = int_to_ptr.vmem [resolvable:$true] %s1057_s20 }
 0x355   : > { %594 = vrot.lane.b32.xlu2 %v1616_v33, %s1412_s13 }
 0x35d   : > { %824 = vrot.lane.b32.xlu2 %v1616_v33, %s1413_s19 }
 0x365   : > { %720 = vrot.lane.b32.xlu2 %v1616_v33, %s1414_s18 }
 0x3a8   : > { %v551_v47 = vpop.xlane.xlu2 %550 }
 0x3a9   : > { %1255 = vrcp.f32 %v551_v47  ;;  %v563_v52 = vand.u32 2147483648, %v551_v47  ;;  %v561_v54 = vand.u32 2147483647, %v551_v47  ;;  %vm557_vm7 = vweird.f32 %v551_v47 }
 0x3ab   : > { %v564_v56 = vor.u32 1.1754944e-38, %v563_v52  ;;  %vm562_vm9 = vcmp.eq.f32.partialorder %v561_v54, 8.507059e+37 }
 0x3af   : > { %v1256_v48 = vpop.eup %1255 }
 0x3b0   : > { %v553_v49 = vmul.f32 %v1256_v48, %v551_v47  ;;  %v568_v50 = vpop.permute.xlu2 %567  ;;  %vm558_vm6 = vweird.f32 %v1256_v48 }
 0x3b1   : > { %588 = vmatpush.msra.mxu2 %v568_v50  ;;  %vm559_vm8 = vmor %vm557_vm7, %vm558_vm6 }
 0x3b2   : > { %v554_v51 = vsub.f32 1.0, %v553_v49 }
 0x3b4   : > { %v555_v53 = vmul.f32 %v1256_v48, %v554_v51 }
 0x3b6   : > { %v556_v55 = vadd.f32 %v1256_v48, %v555_v53 }
 0x3b8   : > { %v595_v57 = vpop.permute.xlu2 %594  ;;  %v560_v58 = vsel %vm559_vm8, %v1256_v48, %v556_v55 }
 0x3b9   : > { %1155 = vmatmul.msk.f32.vlgmr.msrb.gmra.mxu0 %vm517_vm5, %v595_v57  ;;  %v565_v59 = vsel %vm562_vm9, %v564_v56, %v560_v58 }
 0x3ba   : > { %v566_v60 = vmul.f32 %v1254_v45, %v565_v59 }
 0x3bc   : > { %1153 = vmatmul.msk.f32.vlgmr.msra.gmra.mxu2 %vm517_vm5, %v566_v60 }
 0x3c0   : > { %v825_v61 = vpop.permute.xlu2 %824 }
 0x3c8   : > { %v721_v62 = vpop.permute.xlu2 %720 }
 0x3c9   : > { %1160 = vmatmul.msk.f32.vlgmr.msra.gmra.mxu0 %vm517_vm5, %v721_v62 }
 0x436   : > { %v619_v63 = vpop.f32.mrf.mxu0 }
 0x437   : > { %v622_v1 = vmul.f32 0.35355338, %v619_v63 }
 0x439   : > { %v623_v2 = vsel %vm517_vm5, %v622_v1, -inf }
 0x43a   : > { %624 = vmax.xlane.f32.xlu1 %v623_v2 }
 0x43f   : > { %v590_v3 = vpop.f32.mrf.mxu2 }
 0x440   : > { %1158 = vmatmul.msk.f32.vlgmr.msra.gmra.mxu3 %vm517_vm5, %v590_v3  ;;  %v903_v3 = vld [vmem:[%s1779_s4 + $0x18] sm:$0xff] }
 0x446   : > { %v745_v4 = vpop.f32.mrf.mxu0 }
 0x447   : > { %v748_v5 = vmul.f32 0.35355338, %v745_v4  ;;  %v673_v4 = vld [vmem:[%s1779_s4 + $0x8] sm:$0xff] }
 0x448   : > { %1164 = vmatmul.msk.f32.vlgmr.msrb.gmra.mxu3 %vm517_vm5, %v825_v61  ;;  %692 = vmatpush.msrb.mxu1 %v673_v4 }
 0x449   : > { %v749_v6 = vsel %vm517_vm5, %v748_v5, -inf }
 0x44a   : > { %750 = vmax.xlane.f32.xlu0 %v749_v6 }
 0x45e   : > { %773 = vrot.lane.b32.xlu0 %v1616_v33, %s1415_s28 }
 0x4ad   : > { %v625_v7 = vpop.xlane.xlu1 %624 }
 0x4ae   : > { %v626_v9 = vsub.f32 %v622_v1, %v625_v7 }
 0x4b0   : > { %v627_v10 = vmul.f32 1.442695, %v626_v9 }
 0x4b2   : > { %1257 = vpow2.f32 %v627_v10 }
 0x4b8   : > { %v1645_v11 = vpop.eup %1257 }
 0x4b9   : > { %v629_v12 = vsel %vm517_vm5, %v1645_v11, 0.0 }
 0x4ba   : > { %630 = vadd.xlane.f32.xlu1 %v629_v12 }
 0x4bd   : > { %v751_v13 = vpop.xlane.xlu0 %750 }
 0x4be   : > { %v752_v14 = vsub.f32 %v748_v5, %v751_v13  ;;  %v799_v5 = vld [vmem:[%s1779_s4 + $0x10] sm:$0xff] }
 0x4bf   : > { %818 = vmatpush.msra.mxu1 %v799_v5 }
 0x4c0   : > { %v753_v15 = vmul.f32 1.442695, %v752_v14  ;;  %v1244_v14 = vld [vmem:[%s1780_s5] ss:$0 sm:$0xff] }
 0x4c2   : > { %1259 = vpow2.f32 %v753_v15 }
 0x4c3   : > { %v1649_v16 = vpop.f32.mrf.mxu3 }
 0x4c8   : > { %v1651_v17 = vpop.eup %1259 }
 0x4c9   : > { %v755_v18 = vsel %vm517_vm5, %v1651_v17, 0.0 }
 0x4ca   : > { %756 = vadd.xlane.f32.xlu1 %v755_v18 }
 0x4cb   : > { %v849_v19 = vpop.f32.mrf.mxu3 }
 0x4cc   : > { %v852_v20 = vmul.f32 0.35355338, %v849_v19 }
 0x4ce   : > { %v853_v21 = vsel %vm517_vm5, %v852_v20, -inf }
 0x4cf   : > { %854 = vmax.xlane.f32.xlu2 %v853_v21 }
 0x4d0   : > { %v774_v61 = vpop.permute.xlu0 %773 }
 0x4e7   : > { %877 = vrot.lane.b32.xlu2 %v1616_v33, %s1416_s17 }
 0x52d   : > { %v631_v28 = vpop.xlane.xlu1 %630 }
 0x52e   : > { %v643_v46 = vand.u32 2147483648, %v631_v28  ;;  %vm637_vm14 = vweird.f32 %v631_v28  ;;  %v641_v48 = vand.u32 2147483647, %v631_v28 }
 0x530   : > { %v644_v54 = vor.u32 1.1754944e-38, %v643_v46  ;;  %vm642_vm2 = vcmp.eq.f32.partialorder %v641_v48, 8.507059e+37  ;;  %v1009_v46 = vld [vmem:[%s1785_s10 + $0x18] sm:$0xff]  ;;  %v1007_v48 = vld [vmem:[%s1785_s10 + $0x8] sm:$0xff] }
 0x53d   : > { %v757_v29 = vpop.xlane.xlu1 %756 }
 0x53e   : > { %v769_v57 = vand.u32 2147483648, %v757_v29  ;;  %vm763_vm4 = vweird.f32 %v757_v29  ;;  %v767_v58 = vand.u32 2147483647, %v757_v29 }
 0x540   : > { %v770_v63 = vor.u32 1.1754944e-38, %v769_v57  ;;  %vm768_vm7 = vcmp.eq.f32.partialorder %v767_v58, 8.507059e+37 }
 0x542   : > { %v855_v22 = vpop.xlane.xlu2 %854 }
 0x543   : > { %v856_v23 = vsub.f32 %v852_v20, %v855_v22 }
 0x545   : > { %v857_v24 = vmul.f32 1.442695, %v856_v23 }
 0x547   : > { %1261 = vpow2.f32 %v857_v24 }
 0x548   : > { %1263 = vrcp.f32 %v631_v28 }
 0x549   : > { %1265 = vrcp.f32 %v757_v29 }
 0x54a   : > { %v878_v25 = vpop.permute.xlu2 %877 }
 0x54b   : > { %898 = vmatpush.msrb.mxu0 %v878_v25  ;;  %v969_v25 = vld [vmem:[%s1783_s8 + $0x18] sm:$0xff] }
 0x54d   : > { %v1262_v26 = vpop.eup %1261 }
 0x54e   : > { %v859_v27 = vsel %vm517_vm5, %v1262_v26, 0.0  ;;  %v1264_v30 = vpop.eup %1263 }
 0x54f   : > { %860 = vadd.xlane.f32.xlu1 %v859_v27  ;;  %v633_v32 = vmul.f32 %v1264_v30, %v631_v28  ;;  %v1266_v34 = vpop.eup %1265  ;;  %vm638_vm11 = vweird.f32 %v1264_v30  ;;  %v966_v27 = vld [vmem:[%s1783_s8] sm:$0xff] }
 0x550   : > { %v759_v39 = vmul.f32 %v1266_v34, %v757_v29  ;;  %vm639_vm1 = vmor %vm637_vm14, %vm638_vm11  ;;  %vm764_vm3 = vweird.f32 %v1266_v34 }
 0x551   : > { %v634_v35 = vsub.f32 1.0, %v633_v32  ;;  %vm765_vm6 = vmor %vm763_vm4, %vm764_vm3 }
 0x552   : > { %v760_v44 = vsub.f32 1.0, %v759_v39 }
 0x553   : > { %v635_v38 = vmul.f32 %v1264_v30, %v634_v35 }
 0x554   : > { %v761_v51 = vmul.f32 %v1266_v34, %v760_v44  ;;  %v1011_v44 = vld [vmem:[%s1785_s10 + $0x28] sm:$0xff] }
 0x556   : > { %v762_v56 = vadd.f32 %v1266_v34, %v761_v51 }
 0x558   : > { %v766_v62 = vsel %vm765_vm6, %v1266_v34, %v762_v56 }
 0x559   : > { %v771_v1 = vsel %vm768_vm7, %v770_v63, %v766_v62  ;;  %v1248_v62 = vld [vmem:[%s1786_s11] ss:$0 sm:$0xff] }
 0x55a   : > { %v772_v2 = vmul.f32 %v1651_v17, %v771_v1 }
 0x568   : > { %647 = vrot.lane.b32.xlu1 %v1616_v33, %s1417_s30  ;;  %v636_v33 = vadd.f32 %v1264_v30, %v635_v38  ;;  %v1245_v38 = vld [vmem:[%s1781_s6] ss:$0 sm:$0xff]  ;;  %s1170_s30 = sshll.u32 %s1504_s25, 3  ;;  %s1045_s25 = scalar_lea.sflag [#allocation4], %s1576_s29 }
 0x569   : > { %s1055_s27 = scalar_lea.hbm %s1787_s12, %s1170_s30 }
 0x56a   : > { %v640_v53 = vsel %vm639_vm1, %v1264_v30, %v636_v33  ;;  %v1012_v33 = vld [vmem:[%s1785_s10 + $0x30] sm:$0xff]  ;;  %s1059_s13 = sshll.u32 %s1055_s27, 4  ;;  %s1060_s13 = int_to_ptr.hbm [resolvable:$true] %s1059_s13 }
 0x56b   : > { %v645_v55 = vsel %vm642_vm2, %v644_v54, %v640_v53  ;;  %s1347_s19 = sshra.s32 %s1060_s13, 4  ;;  %s1348_s19 = int_to_ptr.hbm [resolvable:$true] %s1347_s19 }
 0x56c   : > { %v646_v60 = vmul.f32 %v1645_v11, %v645_v55  ;;  %s1349_s18 = scalar_lea.hbm %s1348_s19, 8  ;;  %p1354_p9 = scmp.lt.s32.totalorder %s1348_s19, %s1787_s12 }
 0x56d   : > { %p1350_p1 = scmp.ne.s32.totalorder %s1348_s19, %s1349_s18  ;;  %p1355_p10 = scmp.lt.s32.totalorder %s1353_s16, %s1349_s18 }
 0x56f   : > { %p1351_p4 = pnand %p1350_p1, %p1549_p3  ;;  %p1356_p2 = por %p1355_p10, %p1354_p9 }
 0x571   : > { %p1352_p8 = pneg %p1351_p4 }
 0x573   : > { %p1357_p11 = pnand %p1356_p2, %p1352_p8 }
 0x5c2   : > { %v861_v31 = vpop.xlane.xlu1 %860 }
 0x5c3   : > { %1267 = vrcp.f32 %v861_v31  ;;  %v873_v41 = vand.u32 2147483648, %v861_v31  ;;  %v871_v43 = vand.u32 2147483647, %v861_v31  ;;  %vm867_vm12 = vweird.f32 %v861_v31 }
 0x5c5   : > { %v874_v47 = vor.u32 1.1754944e-38, %v873_v41  ;;  %vm872_vm15 = vcmp.eq.f32.partialorder %v871_v43, 8.507059e+37  ;;  %v1013_v43 = vld [vmem:[%s1785_s10 + $0x38] sm:$0xff] }
 0x5c6   : > { %1030 = vmatpush.msra.mxu3 %v1013_v43 }
 0x5c8   : > { %1031 = vmatpush.msra.mxu3 %v1012_v33 }
 0x5c9   : > { %v1268_v36 = vpop.eup %1267 }
 0x5ca   : > { %v863_v37 = vmul.f32 %v1268_v36, %v861_v31  ;;  %vm868_vm10 = vweird.f32 %v1268_v36  ;;  %1032 = vmatpush.msra.mxu3 %v1011_v44 }
 0x5cb   : > { %vm869_vm13 = vmor %vm867_vm12, %vm868_vm10  ;;  %vm1018_vm10 = vcmask 523264  }
 0x5cc   : > { %v864_v40 = vsub.f32 1.0, %v863_v37 }
 0x5ce   : > { %v865_v42 = vmul.f32 %v1268_v36, %v864_v40 }
 0x5d0   : > { %v866_v45 = vadd.f32 %v1268_v36, %v865_v42 }
 0x5d2   : > { %v870_v49 = vsel %vm869_vm13, %v1268_v36, %v866_v45  ;;  %v1010_v45 = vld [vmem:[%s1785_s10 + $0x20] sm:$0xff] }
 0x5d3   : > { %v875_v50 = vsel %vm872_vm15, %v874_v47, %v870_v49  ;;  %1033 = vmatpush.msra.mxu3 %v1010_v45  ;;  %v1008_v47 = vld [vmem:[%s1785_s10 + $0x10] sm:$0xff]  ;;  %v1006_v49 = vld [vmem:[%s1785_s10] sm:$0xff] }
 0x5d4   : > { %v876_v52 = vmul.f32 %v1262_v26, %v875_v50  ;;  %v967_v26 = vld [vmem:[%s1783_s8 + $0x8] sm:$0xff]  ;;  %v1247_v50 = vld [vmem:[%s1784_s9] ss:$0 sm:$0xff] }
 0x5d5   : > { %1034 = vmatpush.msra.mxu3 %v1009_v46 }
 0x5d6   : > { %1165 = vmatmul.msk.f32.vlgmr.msrb.gmra.mxu0 %vm517_vm5, %v876_v52 }
 0x5d7   : > { %1035 = vmatpush.msra.mxu3 %v1008_v47 }
 0x5d9   : > { %1036 = vmatpush.msra.mxu3 %v1007_v48 }
 0x5da   : > { %v648_v59 = vpop.permute.xlu1 %647 }
 0x5db   : > { %668 = vmatpush.msrb.mxu2 %v648_v59  ;;  %1037 = vmatpush.msra.mxu3 %v1006_v49 }
 0x5dc   : > { %1156 = vmatmul.msk.f32.vlgmr.msrb.gmra.mxu2 %vm517_vm5, %v646_v60 }
 0x5dd   : > { %794 = vmatpush.msra.mxu2 %v774_v61 }
 0x5df   : > { %922 = vmatpush.msrb.mxu2 %v903_v3 }
 0x5e4   : > { %1161 = vmatmul.msk.f32.vlgmr.msra.gmra.mxu2 %vm517_vm5, %v772_v2 }
 0x653   : > { %v900_v6 = vpop.f32.mrf.mxu0 }
 0x654   : > { %1166 = vmatmul.msk.f32.vlgmr.msrb.gmra.mxu2 %vm517_vm5, %v900_v6 }
 0x65f   : > { %v670_v7 = vpop.f32.mrf.mxu2 }
 0x660   : > { %1157 = vmatmul.msk.f32.vlgmr.msrb.gmra.mxu1 %vm517_vm5, %v670_v7 }
 0x661   : > { %989 = vmatpush.msrb.mxu1 %v969_v25 }
 0x667   : > { %v796_v9 = vpop.f32.mrf.mxu2 }
 0x668   : > { %1162 = vmatmul.msk.f32.vlgmr.msra.gmra.mxu1 %vm517_vm5, %v796_v9 }
 0x6d7   : > { %v924_v15 = vpop.f32.mrf.mxu2 }
 0x6dd   : > { %v694_v10 = vpop.f32.mrf.mxu1 }
 0x6de   : > { %v718_v11 = vadd.f32 %v1649_v16, %v694_v10 }
 0x6e5   : > { %v820_v12 = vpop.f32.mrf.mxu1 }
 0x6e6   : > { %v823_v13 = vadd.f32 %v820_v12, %v718_v11 }
 0x6e8   : > { %v927_v17 = vadd.f32 %v924_v15, %v823_v13 }
 0x6ea   : > { %v932_v18 = vadd.f32 %v1244_v14, %v927_v17 }
 0x6ec   : > { %v1681_v19 = vadd.f32 %v932_v18, %v1590_v0  ;;  %v968_v0 = vld [vmem:[%s1783_s8 + $0x10] sm:$0xff] }
 0x6ed   : > { %990 = vmatpush.msrb.mxu1 %v968_v0 }
 0x6ee   : > { %v936_v20 = vsel %vm449_vm0, %v1681_v19, 0.0 }
 0x6ef   : > { %937 = vadd.xlane.f32.xlu1 %v936_v20  ;;  %991 = vmatpush.msrb.mxu1 %v967_v26 }
 0x6f1   : > { %992 = vmatpush.msrb.mxu1 %v966_v27 }
 0x762   : > { %v938_v21 = vpop.xlane.xlu1 %937 }
 0x763   : > { %v939_v22 = vmul.f32 %v938_v21, %v1594_v8 }
 0x765   : > { %v940_v16 = vsub.f32 %v1681_v19, %v939_v22 }
 0x767   : > { %v941_v23 = vmul.f32 %v940_v16, %v940_v16 }
 0x769   : > { %v942_v24 = vsel %vm449_vm0, %v941_v23, 0.0 }
 0x76a   : > { %943 = vadd.xlane.f32.xlu0 %v942_v24 }
 0x7dd   : > { %v944_v28 = vpop.xlane.xlu0 %943 }
 0x7de   : > { %v945_v29 = vmul.f32 %v944_v28, %v1594_v8  ;;  %v1246_v8 = vld [vmem:[%s1782_s7] ss:$0 sm:$0xff] }
 0x7e0   : > { %v946_v30 = vadd.f32 1e-05, %v945_v29 }
 0x7e2   : > { %1269 = vrsqrt.f32 %v946_v30  ;;  %vm953_vm8 = vweird.f32 %v946_v30 }
 0x7e8   : > { %v1270_v31 = vpop.eup %1269 }
 0x7e9   : > { %v948_v32 = vmul.f32 %v1270_v31, %v946_v30  ;;  %vm954_vm5 = vweird.f32 %v1270_v31 }
 0x7ea   : > { %vm955_vm9 = vmor %vm953_vm8, %vm954_vm5 }
 0x7eb   : > { %v949_v34 = vmul.f32 %v1270_v31, %v948_v32 }
 0x7ed   : > { %v950_v35 = vmul.f32 0.5, %v949_v34 }
 0x7ef   : > { %v951_v36 = vsub.f32 1.5, %v950_v35 }
 0x7f1   : > { %v952_v37 = vmul.f32 %v1270_v31, %v951_v36 }
 0x7f3   : > { %v956_v39 = vsel %vm955_vm9, %v1270_v31, %v952_v37 }
 0x7f4   : > { %v957_v40 = vmul.f32 %v956_v39, %v940_v16 }
 0x7f6   : > { %v961_v41 = vmul.f32 %v1245_v38, %v957_v40 }
 0x7f8   : > { %v965_v42 = vadd.f32 %v1246_v8, %v961_v41 }
 0x7fa   : > { %1167 = vmatmul.msk.f32.vlgmr.msrb.gmra.mxu1 %vm449_vm0, %v965_v42 }
 0x877   : > { %v994_v51 = vpop.f32.mrf.mxu1 }
 0x878   : > { %v995_v52 = vadd.f32 %v1247_v50, %v994_v51 }
 0x87a   : > { %v998_v53 = vmul.f32 0.044715, %v995_v52  ;;  %v997_v59 = vmul.f32 0.5, %v995_v52 }
 0x87c   : > { %v999_v54 = vmul.f32 %v998_v53, %v995_v52 }
 0x87e   : > { %v1000_v55 = vmul.f32 %v999_v54, %v995_v52 }
 0x880   : > { %v1001_v56 = vadd.f32 %v1000_v55, %v995_v52 }
 0x882   : > { %v1002_v57 = vmul.f32 0.7978846, %v1001_v56 }
 0x884   : > { %1271 = vtanh.f32 %v1002_v57 }
 0x88a   : > { %v1272_v58 = vpop.eup %1271 }
 0x88b   : > { %v1004_v60 = vadd.f32 1.0, %v1272_v58 }
 0x88d   : > { %v1005_v61 = vmul.f32 %v1004_v60, %v997_v59 }
 0x88f   : > { %1168 = vmatmul.msk.f32.vlgmr.msra.gmra.mxu3 %vm1018_vm10, %v1005_v61 }
 0x912   : > { %v1039_v63 = vpop.f32.mrf.mxu3 }
 0x913   : > { %v1040_v1 = vadd.f32 %v1248_v62, %v1039_v63 }
 0x915   : > { %v1042_v2 = vadd.f32 %v1040_v1, %v1681_v19 }
 0x917   : > { %1043 = vst.msk [vmem:[%s445_s14] sm:$0xff] %vm449_vm0, %v1042_v2 }
 0x918   : > { %1360 = shalt.err (!%p1357_p11)
}
 0x919   : > { %1179 = dma.vmem_to_hbm [thread:$0]  (%p1549_p3), %s1058_s20, 128, %s1060_s13, %s1045_s25  }
 0x91a PF: > { %s1805_s29 = sld [smem:[#allocation11_spill]]  ;;  %p1807_p12 = scmp.ge.s32.totalorder %s1403_s24, 2 }
 0x91c   : > { %p1190_p13 = pnand %p1807_p12, %p1518_p6 }
 0x91e   : > { %p1191_p0 = pneg %p1190_p13 }
 0x920   : > { %s1071_s21 = sand.u32 1, %s1805_s29  }
 0x921   : > { %s1072_s23 = scalar_lea.sflag [#allocation4], %s1071_s21 }
 0x922   : > { %1386 = dma.done.wait (%p1191_p0), %s1072_s23, 128  }
 0x923   : > { %1388 = vsyncadd (%p1191_p0), %s1072_s23, 4294967168  ;;  %s1808_s24 = sld [smem:[#allocation14_spill]]  ;;  %s1811_s21 = smov %s1395_s22 }
 0x924   : > { %s1809_s27 = sld [smem:[#allocation12_spill]] }
 0x925   : > { %s1810_s23 = sld [smem:[#allocation15_spill]] }
 0x929   : > { %p26_p5 = scmp.ge.s32.totalorder %s1808_s24, 4  }
 0x92a   : > { %s1812_s22 = smov %s1809_s27 }
 0x92b   :  { %28 = sbr.rel (!%p26_p5) target bundleno = 8 (0x8), region = 117 }
 0x930   :  { %1078 = vsyncpa [#allocation3], 1 }
 0x931   :  { %1080 = vsyncpa [#allocation3 + $0x1], 1 }
 0x932   :  { %1081 = vsyncpa [#allocation6], 1 }
 0x933   :  { %1082 = vsyncpa [#allocation4], 1 }
 0x934   :  { %1084 = vsyncpa [#allocation4 + $0x1], 1 }

</bundles_post_ra>
